<compile_context>
chip_gen: v7x
topology: tpu7x:2x2x1
jax: 0.10.0
libtpu: 0.0.40
codegen_flags: <defaults>
</compile_context>

<pallas_src>
import functools
import math

import jax
import jax.numpy as jnp
from jax.experimental import pallas as pl
from jax.experimental.pallas import tpu as pltpu

HIDDEN = 128  # hidden width == TPU lane width; everything is padded to this.


def _round_up(x, m):
    return ((x + m - 1) // m) * m


def qnetwork_kernel(x_ref, w_ref, b_ref, out_ref, *, state_size):
    """Fused 4-layer MLP forward on one (TM, state_size) row tile.

    x_ref:   (TM, state_size)       activations (f32)
    w_ref:   (4, 128, 128)          stacked weights (bf16 or f32)
    b_ref:   (4, 1, 128)            stacked biases (f32)
    out_ref: (TM, 128)              padded Q-values (f32), cols >= action_size are 0
    """
    w1 = w_ref[0][:state_size, :]                   # static slice, (S, 128)
    compute_dtype = w1.dtype
    x = x_ref[...].astype(compute_dtype)

    h = jnp.dot(x, w1, preferred_element_type=jnp.float32) + b_ref[0]
    h = jnp.maximum(h, 0.0).astype(compute_dtype)   # ReLU (layer1)

    h = jnp.dot(h, w_ref[1], preferred_element_type=jnp.float32) + b_ref[1]
    h = jnp.maximum(h, 0.0).astype(compute_dtype)   # ReLU (layer2)

    h = jnp.dot(h, w_ref[2], preferred_element_type=jnp.float32) + b_ref[2]
    h = jnp.maximum(h, 0.0).astype(compute_dtype)   # ReLU (layer3)

    # Final layer: lane-dense padded to 128 output columns, no activation.
    q = jnp.dot(h, w_ref[3], preferred_element_type=jnp.float32) + b_ref[3]
    out_ref[...] = q.astype(out_ref.dtype)


def pack_params_for_kernel(params, weights_dtype=jnp.bfloat16):
    """Pack logical f32 params into two kernel-ready slabs (call ONCE per
    parameter update, NOT per forward call).

    Returns (w_stack, b_stack, action_size):
      w_stack: (4, 128, 128) weights_dtype; w1 zero-padded on input rows,
               w4 zero-padded on output columns.
      b_stack: (4, 1, 128)   f32; b4 zero-padded on output columns.
    """
    state_size = params["w1"].shape[0]
    action_size = params["w4"].shape[1]
    hidden = params["w2"].shape[0]
    assert hidden == HIDDEN, "this packing assumes hidden width == 128"
    assert state_size <= HIDDEN and action_size <= HIDDEN

    w_stack = jnp.zeros((4, HIDDEN, HIDDEN), weights_dtype)
    w_stack = w_stack.at[0, :state_size, :].set(params["w1"].astype(weights_dtype))
    w_stack = w_stack.at[1].set(params["w2"].astype(weights_dtype))
    w_stack = w_stack.at[2].set(params["w3"].astype(weights_dtype))
    w_stack = w_stack.at[3, :, :action_size].set(params["w4"].astype(weights_dtype))

    b_stack = jnp.zeros((4, 1, HIDDEN), jnp.float32)
    b_stack = b_stack.at[0].set(params["b1"].astype(jnp.float32))
    b_stack = b_stack.at[1].set(params["b2"].astype(jnp.float32))
    b_stack = b_stack.at[2].set(params["b3"].astype(jnp.float32))
    b_stack = b_stack.at[3, :, :action_size].set(params["b4"].astype(jnp.float32))

    return w_stack, b_stack, action_size


@functools.partial(jax.jit, static_argnames=("action_size", "block_rows"))
def qnetwork_forward(state, w_stack, b_stack, *, action_size, block_rows=None):
    """Jitted wrapper around the fused Pallas kernel.

    state:   (B, state_size) f32
    w_stack: (4, 128, 128)   packed weights (see pack_params_for_kernel)
    b_stack: (4, 1, 128)     packed biases
    returns  (B, action_size) f32 action values
    """
    batch, state_size = state.shape

    if block_rows is None:
        # 256-row tiles fill the 256-wide MXU M dimension on v6e/v7x; 128 is
        # already enough on v5e.  Small batches just use one rounded-up tile.
        block_rows = min(256, _round_up(batch, 8))
    tm = block_rows
    grid = (pl.cdiv(batch, tm),)

    kernel = functools.partial(qnetwork_kernel, state_size=state_size)

    q_padded = pl.pallas_call(
        kernel,
        out_shape=jax.ShapeDtypeStruct((batch, HIDDEN), jnp.float32),
        grid=grid,
        in_specs=[
            # Activations: tiled over the batch rows, pipelined across tiles.
            pl.BlockSpec((tm, state_size), lambda i: (i, 0)),
            # Weights / biases: constant index_map -> VMEM-resident across tiles.
            pl.BlockSpec(w_stack.shape, lambda i: (0, 0, 0)),
            pl.BlockSpec(b_stack.shape, lambda i: (0, 0, 0)),
        ],
        out_specs=pl.BlockSpec((tm, HIDDEN), lambda i: (i, 0)),
        compiler_params=pltpu.CompilerParams(
            dimension_semantics=("parallel",)),  # 2 TCs on v7x; no-op elsewhere
    )(state, w_stack, b_stack)

    # Padded columns are exactly zero (zero weights + zero bias); drop them.
    return q_padded[:, :action_size]


def init_qnetwork_params(key, state_size, action_size, hidden=HIDDEN):
    """Deterministic init mimicking torch nn.Linear default:
    U(-1/sqrt(fan_in), 1/sqrt(fan_in)) for both weights and biases."""
    sizes = [(state_size, hidden), (hidden, hidden),
             (hidden, hidden), (hidden, action_size)]
    params = {}
    for i, (fan_in, fan_out) in enumerate(sizes, start=1):
        key, kw, kb = jax.random.split(key, 3)
        bound = 1.0 / math.sqrt(fan_in)
        params[f"w{i}"] = jax.random.uniform(
            kw, (fan_in, fan_out), jnp.float32, minval=-bound, maxval=bound)
        params[f"b{i}"] = jax.random.uniform(
            kb, (1, fan_out), jnp.float32, minval=-bound, maxval=bound)
    return params


def qnetwork_ref(state, params):
    """Pure-JAX f32 reference for correctness checking."""
    h = jnp.maximum(state @ params["w1"] + params["b1"], 0.0)
    h = jnp.maximum(h @ params["w2"] + params["b2"], 0.0)
    h = jnp.maximum(h @ params["w3"] + params["b3"], 0.0)
    return h @ params["w4"] + params["b4"]


if __name__ == "__main__":
    key = jax.random.PRNGKey(0)
    batch, state_size, action_size = 8, 16, 4

    k_params, k_state = jax.random.split(key)
    params = init_qnetwork_params(k_params, state_size, action_size)
    state = jax.random.normal(k_state, (batch, state_size), jnp.float32)
    q_ref = qnetwork_ref(state, params)

    # --- default bf16-MXU path: pack once, call the jitted forward ----------
    w_stack, b_stack, act = pack_params_for_kernel(params)
    q_vals = qnetwork_forward(state, w_stack, b_stack, action_size=act)
    q_vals = jax.block_until_ready(q_vals)
    assert q_vals.shape == (batch, action_size)
    assert jnp.allclose(q_vals, q_ref, atol=5e-2, rtol=5e-2), (
        f"bf16 path: max abs err = {jnp.max(jnp.abs(q_vals - q_ref))}")

    # --- explicit f32 fallback (tight tolerance) -----------------------------
    w_stack32, b_stack32, act32 = pack_params_for_kernel(
        params, weights_dtype=jnp.float32)
    q_vals32 = qnetwork_forward(state, w_stack32, b_stack32, action_size=act32)
    q_vals32 = jax.block_until_ready(q_vals32)
    assert jnp.allclose(q_vals32, q_ref, atol=1e-4, rtol=1e-4), (
        f"f32 path: max abs err = {jnp.max(jnp.abs(q_vals32 - q_ref))}")

    print("KERNEL_OK")
</pallas_src>

<mosaic_0001>
module attributes {stable_mosaic.version = 11 : i64} {
  func.func @qnetwork_kernel(%arg0: i32, %arg1: memref<8x16xf32, #tpu.memory_space<vmem>>, %arg2: memref<4x128x128xbf16, #tpu.memory_space<vmem>>, %arg3: memref<4x1x128xf32, #tpu.memory_space<vmem>>, %arg4: memref<8x128xf32, #tpu.memory_space<vmem>>) attributes {dimension_semantics = [#tpu.dimension_semantics<parallel>], iteration_bounds = array<i64: 1>, scalar_prefetch = 0 : i64, scratch_operands = 0 : i64, tpu.core_type = #tpu.core_type<tc>, window_params = [{transform_indices = @transform_0, window_bounds = array<i64: 8, 16>}, {pipeline_mode = #tpu.pipeline_mode<synchronous>, transform_indices = @transform_1, window_bounds = array<i64: 4, 128, 128>}, {pipeline_mode = #tpu.pipeline_mode<synchronous>, transform_indices = @transform_2, window_bounds = array<i64: 4, 1, 128>}, {transform_indices = @transform_3, window_bounds = array<i64: 8, 128>}]} {
    %c0 = arith.constant 0 : index
    %c0_0 = arith.constant 0 : index
    %c0_1 = arith.constant 0 : index
    %0 = vector.load %arg2[%c0, %c0_0, %c0_1] : memref<4x128x128xbf16, #tpu.memory_space<vmem>>, vector<1x128x128xbf16>
    %1 = vector.shape_cast %0 : vector<1x128x128xbf16> to vector<128x128xbf16>
    %2 = vector.extract_strided_slice %1 {offsets = [0, 0], sizes = [16, 128], strides = [1, 1]} : vector<128x128xbf16> to vector<16x128xbf16>
    %c0_2 = arith.constant 0 : index
    %c0_3 = arith.constant 0 : index
    %3 = vector.load %arg1[%c0_2, %c0_3] : memref<8x16xf32, #tpu.memory_space<vmem>>, vector<8x16xf32>
    %4 = arith.truncf %3 : vector<8x16xf32> to vector<8x16xbf16>
    %cst = arith.constant dense<0.000000e+00> : vector<8x128xf32>
    %5 = tpu.matmul %4, %2, %cst {dimension_numbers = #tpu.dot_dimension_numbers<[1], [0], [0], [1], [0, 0, 1, 1], [], []>} : vector<8x16xbf16>, vector<16x128xbf16>, vector<8x128xf32> -> vector<8x128xf32>
    %c0_4 = arith.constant 0 : index
    %c0_5 = arith.constant 0 : index
    %c0_6 = arith.constant 0 : index
    %6 = vector.load %arg3[%c0_4, %c0_5, %c0_6] : memref<4x1x128xf32, #tpu.memory_space<vmem>>, vector<1x1x128xf32>
    %7 = vector.shape_cast %6 : vector<1x1x128xf32> to vector<1x128xf32>
    %8 = vector.broadcast %7 : vector<1x128xf32> to vector<8x128xf32>
    %9 = arith.addf %5, %8 : vector<8x128xf32>
    %cst_7 = arith.constant 0.000000e+00 : f32
    %10 = vector.broadcast %cst_7 : f32 to vector<8x128xf32>
    %11 = arith.maximumf %9, %10 : vector<8x128xf32>
    %12 = arith.truncf %11 : vector<8x128xf32> to vector<8x128xbf16>
    %c1 = arith.constant 1 : index
    %c0_8 = arith.constant 0 : index
    %c0_9 = arith.constant 0 : index
    %13 = vector.load %arg2[%c1, %c0_8, %c0_9] : memref<4x128x128xbf16, #tpu.memory_space<vmem>>, vector<1x128x128xbf16>
    %14 = vector.shape_cast %13 : vector<1x128x128xbf16> to vector<128x128xbf16>
    %cst_10 = arith.constant dense<0.000000e+00> : vector<8x128xf32>
    %15 = tpu.matmul %12, %14, %cst_10 {dimension_numbers = #tpu.dot_dimension_numbers<[1], [0], [0], [1], [0, 0, 1, 1], [], []>} : vector<8x128xbf16>, vector<128x128xbf16>, vector<8x128xf32> -> vector<8x128xf32>
    %c1_11 = arith.constant 1 : index
    %c0_12 = arith.constant 0 : index
    %c0_13 = arith.constant 0 : index
    %16 = vector.load %arg3[%c1_11, %c0_12, %c0_13] : memref<4x1x128xf32, #tpu.memory_space<vmem>>, vector<1x1x128xf32>
    %17 = vector.shape_cast %16 : vector<1x1x128xf32> to vector<1x128xf32>
    %18 = vector.broadcast %17 : vector<1x128xf32> to vector<8x128xf32>
    %19 = arith.addf %15, %18 : vector<8x128xf32>
    %cst_14 = arith.constant 0.000000e+00 : f32
    %20 = vector.broadcast %cst_14 : f32 to vector<8x128xf32>
    %21 = arith.maximumf %19, %20 : vector<8x128xf32>
    %22 = arith.truncf %21 : vector<8x128xf32> to vector<8x128xbf16>
    %c2 = arith.constant 2 : index
    %c0_15 = arith.constant 0 : index
    %c0_16 = arith.constant 0 : index
    %23 = vector.load %arg2[%c2, %c0_15, %c0_16] : memref<4x128x128xbf16, #tpu.memory_space<vmem>>, vector<1x128x128xbf16>
    %24 = vector.shape_cast %23 : vector<1x128x128xbf16> to vector<128x128xbf16>
    %cst_17 = arith.constant dense<0.000000e+00> : vector<8x128xf32>
    %25 = tpu.matmul %22, %24, %cst_17 {dimension_numbers = #tpu.dot_dimension_numbers<[1], [0], [0], [1], [0, 0, 1, 1], [], []>} : vector<8x128xbf16>, vector<128x128xbf16>, vector<8x128xf32> -> vector<8x128xf32>
    %c2_18 = arith.constant 2 : index
    %c0_19 = arith.constant 0 : index
    %c0_20 = arith.constant 0 : index
    %26 = vector.load %arg3[%c2_18, %c0_19, %c0_20] : memref<4x1x128xf32, #tpu.memory_space<vmem>>, vector<1x1x128xf32>
    %27 = vector.shape_cast %26 : vector<1x1x128xf32> to vector<1x128xf32>
    %28 = vector.broadcast %27 : vector<1x128xf32> to vector<8x128xf32>
    %29 = arith.addf %25, %28 : vector<8x128xf32>
    %cst_21 = arith.constant 0.000000e+00 : f32
    %30 = vector.broadcast %cst_21 : f32 to vector<8x128xf32>
    %31 = arith.maximumf %29, %30 : vector<8x128xf32>
    %32 = arith.truncf %31 : vector<8x128xf32> to vector<8x128xbf16>
    %c3 = arith.constant 3 : index
    %c0_22 = arith.constant 0 : index
    %c0_23 = arith.constant 0 : index
    %33 = vector.load %arg2[%c3, %c0_22, %c0_23] : memref<4x128x128xbf16, #tpu.memory_space<vmem>>, vector<1x128x128xbf16>
    %34 = vector.shape_cast %33 : vector<1x128x128xbf16> to vector<128x128xbf16>
    %cst_24 = arith.constant dense<0.000000e+00> : vector<8x128xf32>
    %35 = tpu.matmul %32, %34, %cst_24 {dimension_numbers = #tpu.dot_dimension_numbers<[1], [0], [0], [1], [0, 0, 1, 1], [], []>} : vector<8x128xbf16>, vector<128x128xbf16>, vector<8x128xf32> -> vector<8x128xf32>
    %c3_25 = arith.constant 3 : index
    %c0_26 = arith.constant 0 : index
    %c0_27 = arith.constant 0 : index
    %36 = vector.load %arg3[%c3_25, %c0_26, %c0_27] : memref<4x1x128xf32, #tpu.memory_space<vmem>>, vector<1x1x128xf32>
    %37 = vector.shape_cast %36 : vector<1x1x128xf32> to vector<1x128xf32>
    %38 = vector.broadcast %37 : vector<1x128xf32> to vector<8x128xf32>
    %39 = arith.addf %35, %38 : vector<8x128xf32>
    %c0_28 = arith.constant 0 : index
    %c0_29 = arith.constant 0 : index
    %40 = vector.load %arg4[%c0_28, %c0_29] : memref<8x128xf32, #tpu.memory_space<vmem>>, vector<8x128xf32>
    tpu.vector_store %arg4[%c0_28, %c0_29], %39 {strides = array<i32>} : memref<8x128xf32, #tpu.memory_space<vmem>>, vector<8x128xf32>,
    return
  }
  func.func @transform_0(%arg0: i32) -> (i32, i32) {
    %c0_i32 = arith.constant 0 : i32
    %c0_i32_0 = arith.constant 0 : i32
    return %arg0, %c0_i32 : i32, i32
  }
  func.func @transform_1(%arg0: i32) -> (i32, i32, i32) {
    %c0_i32 = arith.constant 0 : i32
    %c0_i32_0 = arith.constant 0 : i32
    %c0_i32_1 = arith.constant 0 : i32
    %c0_i32_2 = arith.constant 0 : i32
    return %c0_i32, %c0_i32_0, %c0_i32_1 : i32, i32, i32
  }
  func.func @transform_2(%arg0: i32) -> (i32, i32, i32) {
    %c0_i32 = arith.constant 0 : i32
    %c0_i32_0 = arith.constant 0 : i32
    %c0_i32_1 = arith.constant 0 : i32
    %c0_i32_2 = arith.constant 0 : i32
    return %c0_i32, %c0_i32_0, %c0_i32_1 : i32, i32, i32
  }
  func.func @transform_3(%arg0: i32) -> (i32, i32) {
    %c0_i32 = arith.constant 0 : i32
    %c0_i32_0 = arith.constant 0 : i32
    return %arg0, %c0_i32 : i32, i32
  }
}

</mosaic_0001>

<bundles_post_ra>
// kernel: qnetwork_forward.1
= control target key start
LH: loop header
LB: loop body
LE: loop exit
PB: predicated region body
PF: predicated region fallthrough
CT: control target
= control target key end

     0   :  { %8 = vsyncpa [#allocation3], 0  ;;  %s766_s0 = inlined_call_operand.hbm [shape: f32[8,16], index: 0, kind: input, shape index: {}]   ;;  %s767_s1 = inlined_call_operand.hbm [shape: bf16[4,128,128], index: 1, kind: input, shape index: {}]   ;;  %s768_s2 = inlined_call_operand.vmem [shape: f32[4,1,128], index: 2, kind: input, shape index: {}]   ;;  %s769_s3 = inlined_call_operand.vmem [shape: f32[8,128], index: 3, kind: output, shape index: {}]  }
   0x1   :  { %9 = vsyncpa [#allocation5], 0  ;;  %s661_s12 = smov [#allocation2]   ;;  %s662_s14 = smov [#allocation4]  }
   0x2   :  { %s16_s13 = sshll.u32 %s661_s12, 4  ;;  %s25_s15 = sshll.u32 %s662_s14, 4  ;;  %s17_s13 = int_to_ptr.vmem [resolvable:$true] %s16_s13  ;;  %s687_s15 = int_to_ptr.vmem [resolvable:$true] %s25_s15 }
   0x3   :  { %s613_s18 = scalar_lea.hbm %s766_s0, 128 }
   0x4   :  { %p614_p0 = scmp.ne.s32.totalorder %s766_s0, %s613_s18  ;;  %p617_p1 = scmp.lt.u32.totalorder %s613_s18, %s766_s0 }
   0x6   :  { %p619_p2 = pnand %p617_p1, %p614_p0 }
   0x8   :  { %622 = shalt.err (!%p619_p2)
}
   0x9   :  { %s623_s23 = scalar_lea.vmem %s17_s13, 128  ;;  %p628_p4 = scmp.lt.s32.totalorder %s17_s13, %s17_s13 }
   0xa   :  { %p624_p3 = scmp.ne.s32.totalorder %s17_s13, %s623_s23  ;;  %p629_p5 = scmp.lt.s32.totalorder %s623_s23, %s623_s23 }
   0xc   :  { %p630_p6 = por %p629_p5, %p628_p4 }
   0xe   :  { %p631_p7 = pnand %p630_p6, %p624_p3 }
  0x10   :  { %634 = shalt.err (!%p631_p7)
}
  0x11   :  { %19 = dma.hbm_to_vmem [thread:$0]  %s766_s0, 128, %s17_s13, [#allocation3]  }
  0x12   :  { %s635_s28 = scalar_lea.hbm %s767_s1, 4096 }
  0x13   :  { %p636_p8 = scmp.ne.s32.totalorder %s767_s1, %s635_s28  ;;  %p639_p9 = scmp.lt.u32.totalorder %s635_s28, %s767_s1 }
  0x15   :  { %p641_p10 = pnand %p639_p9, %p636_p8 }
  0x17   :  { %644 = shalt.err (!%p641_p10)
}
  0x18   :  { %s645_s6 = scalar_lea.vmem %s687_s15, 4096  ;;  %p650_p12 = scmp.lt.s32.totalorder %s687_s15, %s687_s15 }
  0x19   :  { %p646_p11 = scmp.ne.s32.totalorder %s687_s15, %s645_s6  ;;  %p651_p13 = scmp.lt.s32.totalorder %s645_s6, %s645_s6 }
  0x1b   :  { %p652_p0 = por %p651_p13, %p650_p12 }
  0x1d   :  { %p653_p1 = pnand %p652_p0, %p646_p11 }
  0x1f   :  { %656 = shalt.err (!%p653_p1)
}
  0x20   :  { %s663_s0 = smov 64   ;;  %s664_s7 = smov 4  }
  0x21   :  { %31 = dma.hbm_to_vmem [thread:$0]  %s767_s1, 4096, %s687_s15, [#allocation5], %s663_s0, %s663_s0, %s664_s7  }
  0x22   :  { %657 = dma.done.wait [#allocation3], 128  }
  0x23   :  { %658 = vsyncadd [#allocation3], 4294967168 }
  0x24   :  { %659 = dma.done.wait [#allocation5], 4096  }
  0x25   :  { %660 = vsyncadd [#allocation5], 4294963200  ;;  %v665_v0 = vmov 0.0   ;;  %vm666_vm0 = vmmov 0   ;;  %v588_v1 = vld [vmem:[#allocation4] sm:$0xff]   ;;  %v43_v2 = vld [vmem:[#allocation2] sm:$0xff] }
  0x26   :  { %516 = vmatprep.subr.bf16.mxu0 %v665_v0  ;;  %518 = vmatprep.mubr.msk.bf16.mxu0 %vm666_vm0, %v665_v0  ;;  %v44_v3 = vpack.c.bf16 %v43_v2, %v43_v2  ;;  %vm58_vm1 = vcmask 130048   ;;  %v589_v4 = vld [vmem:[#allocation4 + $0x40] sm:$0xff]   ;;  %v590_v5 = vld [vmem:[#allocation4 + $0x48] sm:$0xff]   ;;  %v591_v6 = vld [vmem:[#allocation4 + $0x50] sm:$0xff]  }
  0x27   :  { %522 = vmatprep.subr.bf16.mxu1 %v665_v0  ;;  %538 = vmatprep.mubr.msk.bf16.mxu1 %vm666_vm0, %v665_v0  ;;  %v592_v7 = vld [vmem:[#allocation4 + $0x58] sm:$0xff]   ;;  %v593_v8 = vld [vmem:[#allocation4 + $0x60] sm:$0xff]   ;;  %v594_v9 = vld [vmem:[#allocation4 + $0x68] sm:$0xff]  }
  0x28   :  { %517 = vmatpush3.bf16.msra.mxu0 %v588_v1  ;;  %523 = vmatpush3.bf16.msra.mxu1 %v589_v4  ;;  %v595_v10 = vld [vmem:[#allocation4 + $0x70] sm:$0xff]   ;;  %v596_v11 = vld [vmem:[#allocation4 + $0x78] sm:$0xff]   ;;  %v597_v12 = vld [vmem:[#allocation4 + $0x80] sm:$0xff]  }
  0x29   :  { %542 = vmatprep.subr.bf16.mxu0 %v665_v0  ;;  %524 = vmatprep.subr.bf16.mxu1 %v665_v0  ;;  %v598_v13 = vld [vmem:[#allocation4 + $0x88] sm:$0xff]   ;;  %v599_v14 = vld [vmem:[#allocation4 + $0x90] sm:$0xff]   ;;  %v600_v15 = vld [vmem:[#allocation4 + $0x98] sm:$0xff]  }
  0x2a   :  { %v601_v16 = vld [vmem:[#allocation4 + $0xa0] sm:$0xff]   ;;  %v602_v17 = vld [vmem:[#allocation4 + $0xa8] sm:$0xff]   ;;  %v454_v18 = vld [vmem:[%s768_s2] ss:$0 sm:$0xff] }
  0x2b   :  { %519 = vmatmul.mubr.msk.bf16.vlgmr.msra.gmra.mrb[0].mxu0 %vm58_vm1, %v44_v3  ;;  %v603_v26 = vld [vmem:[#allocation4 + $0xb0] sm:$0xff]   ;;  %v604_v27 = vld [vmem:[#allocation4 + $0xb8] sm:$0xff]   ;;  %v605_v28 = vld [vmem:[#allocation4 + $0xc0] sm:$0xff]  }
  0x2c   :  { %558 = vmatprep.mubr.msk.bf16.mxu0 %vm666_vm0, %v665_v0  ;;  %525 = vmatpush3.bf16.msra.mxu1 %v590_v5  ;;  %v606_v29 = vld [vmem:[#allocation4 + $0xc8] sm:$0xff]   ;;  %v607_v30 = vld [vmem:[#allocation4 + $0xd0] sm:$0xff]   ;;  %v608_v31 = vld [vmem:[#allocation4 + $0xd8] sm:$0xff]  }
  0x2d   :  { %526 = vmatprep.subr.bf16.mxu1 %v665_v0  ;;  %543 = vmatpush3.bf16.msra.mxu0 %v597_v12  ;;  %v609_v32 = vld [vmem:[#allocation4 + $0xe0] sm:$0xff]   ;;  %v610_v33 = vld [vmem:[#allocation4 + $0xe8] sm:$0xff]   ;;  %v458_v34 = vld [vmem:[%s768_s2 + $0x1] ss:$0 sm:$0xff] }
  0x2e   :  { %544 = vmatprep.subr.bf16.mxu0 %v665_v0  ;;  %v611_v42 = vld [vmem:[#allocation4 + $0xf0] sm:$0xff]   ;;  %v612_v43 = vld [vmem:[#allocation4 + $0xf8] sm:$0xff]  }
  0x2f   :  { %v468_v44 = vld [vmem:[%s768_s2 + $0x2] ss:$0 sm:$0xff]  ;;  %v478_v52 = vld [vmem:[%s768_s2 + $0x3] ss:$0 sm:$0xff] }
  0x30   :  { %527 = vmatpush3.bf16.msra.mxu1 %v591_v6 }
  0x31   :  { %528 = vmatprep.subr.bf16.mxu1 %v665_v0  ;;  %545 = vmatpush3.bf16.msra.mxu0 %v598_v13 }
  0x32   :  { %546 = vmatprep.subr.bf16.mxu0 %v665_v0 }
  0x34   :  { %529 = vmatpush3.bf16.msra.mxu1 %v592_v7 }
  0x35   :  { %530 = vmatprep.subr.bf16.mxu1 %v665_v0  ;;  %547 = vmatpush3.bf16.msra.mxu0 %v599_v14 }
  0x36   :  { %548 = vmatprep.subr.bf16.mxu0 %v665_v0 }
  0x38   :  { %531 = vmatpush3.bf16.msra.mxu1 %v593_v8 }
  0x39   :  { %532 = vmatprep.subr.bf16.mxu1 %v665_v0  ;;  %549 = vmatpush3.bf16.msra.mxu0 %v600_v15 }
  0x3a   :  { %550 = vmatprep.subr.bf16.mxu0 %v665_v0 }
  0x3c   :  { %533 = vmatpush3.bf16.msra.mxu1 %v594_v9 }
  0x3d   :  { %534 = vmatprep.subr.bf16.mxu1 %v665_v0  ;;  %551 = vmatpush3.bf16.msra.mxu0 %v601_v16 }
  0x3e   :  { %552 = vmatprep.subr.bf16.mxu0 %v665_v0 }
  0x40   :  { %535 = vmatpush3.bf16.msra.mxu1 %v595_v10 }
  0x41   :  { %536 = vmatprep.subr.bf16.mxu1 %v665_v0  ;;  %553 = vmatpush3.bf16.msra.mxu0 %v602_v17 }
  0x42   :  { %554 = vmatprep.subr.bf16.mxu0 %v665_v0 }
  0x44   :  { %537 = vmatpush3.bf16.msra.mxu1 %v596_v11 }
  0x45   :  { %562 = vmatprep.subr.bf16.mxu1 %v665_v0  ;;  %555 = vmatpush3.bf16.msra.mxu0 %v603_v26 }
  0x46   :  { %556 = vmatprep.subr.bf16.mxu0 %v665_v0 }
  0x49   :  { %557 = vmatpush3.bf16.msra.mxu0 %v604_v27 }
  0xfe   :  { %v96_v19 = vpop.f32.mrb[0].mxu0 }
  0xff   :  { %v97_v20 = vadd.f32 %v454_v18, %v96_v19  ;;  %v520_v21 = vpop.f32.mrb[1].mxu0 }
 0x100   :  { %v99_v22 = vpop.f32.mrb[2].mxu0 }
 0x101   :  { %v102_v23 = vmax.f32 %v97_v20, 0.0  ;;  %v521_v24 = vpop.f32.mrb[3].mxu0 }
 0x103   :  { %v103_v25 = vpack.c.bf16 %v102_v23, %v102_v23 }
 0x105   :  { %539 = vmatmul.mubr.bf16.vlgmr.msra.gmra.mrb[0].mxu1 %v103_v25 }
 0x106   :  { %578 = vmatprep.mubr.msk.bf16.mxu1 %vm666_vm0, %v665_v0  ;;  %563 = vmatpush3.bf16.msra.mxu1 %v605_v28 }
 0x107   :  { %564 = vmatprep.subr.bf16.mxu1 %v665_v0 }
 0x10a   :  { %565 = vmatpush3.bf16.msra.mxu1 %v606_v29 }
 0x10b   :  { %566 = vmatprep.subr.bf16.mxu1 %v665_v0 }
 0x10e   :  { %567 = vmatpush3.bf16.msra.mxu1 %v607_v30 }
 0x10f   :  { %568 = vmatprep.subr.bf16.mxu1 %v665_v0 }
 0x112   :  { %569 = vmatpush3.bf16.msra.mxu1 %v608_v31 }
 0x113   :  { %570 = vmatprep.subr.bf16.mxu1 %v665_v0 }
 0x116   :  { %571 = vmatpush3.bf16.msra.mxu1 %v609_v32 }
 0x117   :  { %572 = vmatprep.subr.bf16.mxu1 %v665_v0 }
 0x11a   :  { %573 = vmatpush3.bf16.msra.mxu1 %v610_v33 }
 0x11b   :  { %574 = vmatprep.subr.bf16.mxu1 %v665_v0 }
 0x11e   :  { %575 = vmatpush3.bf16.msra.mxu1 %v611_v42 }
 0x11f   :  { %576 = vmatprep.subr.bf16.mxu1 %v665_v0 }
 0x122   :  { %577 = vmatpush3.bf16.msra.mxu1 %v612_v43 }
 0x1d8   :  { %v211_v35 = vpop.f32.mrb[0].mxu1 }
 0x1d9   :  { %v212_v36 = vadd.f32 %v458_v34, %v211_v35  ;;  %v540_v37 = vpop.f32.mrb[1].mxu1 }
 0x1da   :  { %v214_v38 = vpop.f32.mrb[2].mxu1 }
 0x1db   :  { %v217_v39 = vmax.f32 %v212_v36, 0.0  ;;  %v541_v40 = vpop.f32.mrb[3].mxu1 }
 0x1dd   :  { %v218_v41 = vpack.c.bf16 %v217_v39, %v217_v39 }
 0x1df   :  { %559 = vmatmul.mubr.bf16.vlgmr.msra.gmra.mrb[4].mxu0 %v218_v41 }
 0x2b2   :  { %v326_v45 = vpop.f32.mrb[4].mxu0 }
 0x2b3   :  { %v327_v46 = vadd.f32 %v468_v44, %v326_v45  ;;  %v560_v47 = vpop.f32.mrb[5].mxu0 }
 0x2b4   :  { %v329_v48 = vpop.f32.mrb[6].mxu0 }
 0x2b5   :  { %v332_v49 = vmax.f32 %v327_v46, 0.0  ;;  %v561_v50 = vpop.f32.mrb[7].mxu0 }
 0x2b7   :  { %v333_v51 = vpack.c.bf16 %v332_v49, %v332_v49 }
 0x2b9   :  { %579 = vmatmul.mubr.bf16.vlgmr.msra.gmra.mrb[4].mxu1 %v333_v51 }
 0x38c   :  { %v441_v53 = vpop.f32.mrb[4].mxu1 }
 0x38d   :  { %v442_v54 = vadd.f32 %v478_v52, %v441_v53  ;;  %v580_v55 = vpop.f32.mrb[5].mxu1 }
 0x38e   :  { %v444_v56 = vpop.f32.mrb[6].mxu1 }
 0x38f   :  { %447 = vst [vmem:[%s769_s3] sm:$0xff] %v442_v54  ;;  %v581_v57 = vpop.f32.mrb[7].mxu1 }
 0x390   :  { %452 = vsyncpa [#allocation3], 1 }
 0x391   :  { %453 = vsyncpa [#allocation5], 1 }

</bundles_post_ra>
